<compile_context>
chip_gen: v7x
topology: tpu7x:2x2x1
jax: 0.10.0
libtpu: 0.0.40
codegen_flags: <defaults>
</compile_context>

<pallas_src>
import functools
import math

import jax
import jax.numpy as jnp
from jax.experimental import pallas as pl
from jax.experimental.pallas import tpu as pltpu

# Module constants (constructor defaults of the torch module).
MAX_SCALE = 5.0
MIN_SCALE = 1e-4
CM_ALPHA = 0.3
Z_EPS = 1e-7
INIT_TEMP = 0.07


def _vec11(s):
    """Broadcast an SMEM scalar into a (1,1) f32 vector so exp/div use the VPU/EUP."""
    return jnp.full((1, 1), s, dtype=jnp.float32)


def _dyn_threshold_kernel(inv_count, scalars_ref, logits_ref,
                          base_ref, final_ref, acc_ref):
    step = pl.program_id(0)

    @pl.when(step == 0)
    def _():
        acc_ref[...] = jnp.zeros_like(acc_ref)

    # Partial sum of this row tile, kept lane-dense as (1, N).
    acc_ref[...] += jnp.sum(logits_ref[...], axis=0, keepdims=True)

    @pl.when(step == pl.num_programs(0) - 1)
    def _():
        # mean over the whole logits tensor
        total = jnp.sum(acc_ref[...], axis=1, keepdims=True)        # (1, 1)
        mean = total * inv_count

        base_log = _vec11(scalars_ref[0])
        run_mean = _vec11(scalars_ref[1])
        run_std = _vec11(scalars_ref[2])
        f1 = _vec11(scalars_ref[3])

        # base_scale = clamp(exp(param), 1e-4, max_scale)
        base = jnp.clip(jnp.exp(base_log), MIN_SCALE, MAX_SCALE)

        # f1_factor = clamp(1 + (f1 - 0.5) * cm_alpha, 0.5, 2.0)
        f1_factor = jnp.clip(1.0 + (f1 - 0.5) * CM_ALPHA, 0.5, 2.0)

        # adaptive_scale = sigmoid(z) * 2 + 0.5
        z = (mean - run_mean) / (run_std + Z_EPS)
        adaptive = 2.0 / (1.0 + jnp.exp(-z)) + 0.5

        base_ref[...] = base
        final_ref[...] = base * f1_factor * adaptive


def _pick_row_tile(m):
    """Largest sublane-friendly row tile that divides M (bigger tiles amortize DMA)."""
    for t in (512, 256, 128, 64, 32, 16, 8):
        if m % t == 0:
            return t
    return m  # fall back to a single full block


def dynamic_threshold_forward(logits, base_scale_log, running_mean, running_std,
                              f1=0.0, training=False, row_tile=None):
    """Pallas implementation of MemoryEfficientDynamicThreshold.forward.

    Returns a scalar: final_scale if `training` (cm_metrics path), else base_scale.
    """
    logits = logits.astype(jnp.float32)
    m, n = logits.shape
    if row_tile is None:
        row_tile = _pick_row_tile(m)
    assert m % row_tile == 0, "row_tile must divide the number of logit rows"
    grid = (m // row_tile,)

    # One packed scalar array -> single SMEM transfer (no padded VMEM scalar tiles).
    scalars = jnp.asarray(
        [base_scale_log, running_mean, running_std, f1], dtype=jnp.float32)

    base, final = pl.pallas_call(
        functools.partial(_dyn_threshold_kernel, 1.0 / float(m * n)),
        out_shape=(jax.ShapeDtypeStruct((1, 1), jnp.float32),
                   jax.ShapeDtypeStruct((1, 1), jnp.float32)),
        grid=grid,
        in_specs=[
            pl.BlockSpec(memory_space=pltpu.MemorySpace.SMEM),   # packed scalars
            pl.BlockSpec((row_tile, n), lambda i: (i, 0)),       # logits row tile
        ],
        out_specs=[
            pl.BlockSpec((1, 1), lambda i: (0, 0)),              # base_scale
            pl.BlockSpec((1, 1), lambda i: (0, 0)),              # final_scale
        ],
        scratch_shapes=[pltpu.VMEM((1, n), jnp.float32)],        # running row-sum
        compiler_params=pltpu.CompilerParams(
            dimension_semantics=("arbitrary",)),
    )(scalars, logits)

    # Module semantics: training + cm_metrics -> final_scale, otherwise base_scale.
    return final[0, 0] if training else base[0, 0]


def _reference(logits, base_scale_log, running_mean, running_std, f1, training):
    """Pure-JAX reference mirroring the torch forward."""
    base = jnp.clip(jnp.exp(jnp.float32(base_scale_log)), MIN_SCALE, MAX_SCALE)
    if not training:
        return base
    f1_factor = jnp.clip(1.0 + (f1 - 0.5) * CM_ALPHA, 0.5, 2.0)
    z = (jnp.mean(logits) - running_mean) / (running_std + Z_EPS)
    adaptive = jax.nn.sigmoid(z) * 2.0 + 0.5
    return base * f1_factor * adaptive


if __name__ == "__main__":
    key = jax.random.PRNGKey(0)

    # Small stand-in for the similarity logits fed to the dynamic threshold.
    M, N = 64, 128
    logits = 0.3 * jax.random.normal(key, (M, N), jnp.float32)

    base_scale_log = math.log(INIT_TEMP)   # nn.Parameter init: log(init_temp)
    running_mean = 0.0                     # registered buffer init
    running_std = 1.0                      # registered buffer init
    f1 = 0.8                               # cm_metrics['f1']

    # Training path (uses logits mean + cm_metrics); row_tile=16 -> 4-step reduction grid.
    final_scale = dynamic_threshold_forward(
        logits, base_scale_log, running_mean, running_std,
        f1=f1, training=True, row_tile=16)
    final_scale = jax.block_until_ready(final_scale)

    # Eval path (returns the clamped base scale only).
    base_scale = dynamic_threshold_forward(
        logits, base_scale_log, running_mean, running_std, training=False)
    base_scale = jax.block_until_ready(base_scale)

    ref_final = _reference(logits, base_scale_log, running_mean, running_std, f1, True)
    ref_base = _reference(logits, base_scale_log, running_mean, running_std, f1, False)

    assert final_scale.shape == () and final_scale.dtype == jnp.float32
    assert base_scale.shape == () and base_scale.dtype == jnp.float32
    assert jnp.allclose(final_scale, ref_final, rtol=1e-5, atol=1e-6), "final_scale mismatch"
    assert jnp.allclose(base_scale, ref_base, rtol=1e-5, atol=1e-6), "base_scale mismatch"

    print("KERNEL_OK")
</pallas_src>

<mosaic_0001>
module attributes {stable_mosaic.version = 11 : i64} {
  func.func @_dyn_threshold_kernel(%arg0: i32, %arg1: memref<4xf32, #tpu.memory_space<smem>>, %arg2: memref<16x128xf32, #tpu.memory_space<vmem>>, %arg3: memref<1x1xf32, #tpu.memory_space<vmem>>, %arg4: memref<1x1xf32, #tpu.memory_space<vmem>>, %arg5: memref<1x128xf32, #tpu.memory_space<vmem>>) attributes {dimension_semantics = [#tpu.dimension_semantics<arbitrary>], iteration_bounds = array<i64: 4>, scalar_prefetch = 0 : i64, scratch_operands = 1 : i64, tpu.core_type = #tpu.core_type<tc>, window_params = [{transform_indices = @transform_0, window_bounds = array<i64: 4>}, {transform_indices = @transform_1, window_bounds = array<i64: 16, 128>}, {pipeline_mode = #tpu.pipeline_mode<synchronous>, transform_indices = @transform_2, window_bounds = array<i64: 1, 1>}, {pipeline_mode = #tpu.pipeline_mode<synchronous>, transform_indices = @transform_3, window_bounds = array<i64: 1, 1>}]} {
    %c0_i32 = arith.constant 0 : i32
    %0 = arith.cmpi eq, %arg0, %c0_i32 : i32
    %1 = arith.extui %0 : i1 to i32
    %c0_i32_0 = arith.constant 0 : i32
    %2 = arith.cmpi ne, %1, %c0_i32_0 : i32
    scf.if %2 {
      %cst_7 = arith.constant 0.000000e+00 : f32
      %12 = vector.broadcast %cst_7 : f32 to vector<1x128xf32>
      %c0_8 = arith.constant 0 : index
      %c0_9 = arith.constant 0 : index
      %13 = vector.load %arg5[%c0_8, %c0_9] : memref<1x128xf32, #tpu.memory_space<vmem>>, vector<1x128xf32>
      tpu.vector_store %arg5[%c0_8, %c0_9], %12 {strides = array<i32>} : memref<1x128xf32, #tpu.memory_space<vmem>>, vector<1x128xf32>,
    } else {
    }
    %c0 = arith.constant 0 : index
    %c0_1 = arith.constant 0 : index
    %3 = vector.load %arg5[%c0, %c0_1] : memref<1x128xf32, #tpu.memory_space<vmem>>, vector<1x128xf32>
    %c0_2 = arith.constant 0 : index
    %c0_3 = arith.constant 0 : index
    %4 = vector.load %arg2[%c0_2, %c0_3] : memref<16x128xf32, #tpu.memory_space<vmem>>, vector<16x128xf32>
    %cst = arith.constant dense<0.000000e+00> : vector<128xf32>
    %5 = vector.multi_reduction <add>, %4, %cst [0] : vector<16x128xf32> to vector<128xf32>
    %6 = vector.shape_cast %5 : vector<128xf32> to vector<1x128xf32>
    %7 = arith.addf %3, %6 : vector<1x128xf32>
    %c0_4 = arith.constant 0 : index
    %c0_5 = arith.constant 0 : index
    %8 = vector.load %arg5[%c0_4, %c0_5] : memref<1x128xf32, #tpu.memory_space<vmem>>, vector<1x128xf32>
    tpu.vector_store %arg5[%c0_4, %c0_5], %7 {strides = array<i32>} : memref<1x128xf32, #tpu.memory_space<vmem>>, vector<1x128xf32>,
    %c3_i32 = arith.constant 3 : i32
    %9 = arith.cmpi eq, %arg0, %c3_i32 : i32
    %10 = arith.extui %9 : i1 to i32
    %c0_i32_6 = arith.constant 0 : i32
    %11 = arith.cmpi ne, %10, %c0_i32_6 : i32
    scf.if %11 {
      %c0_7 = arith.constant 0 : index
      %c0_8 = arith.constant 0 : index
      %12 = vector.load %arg5[%c0_7, %c0_8] : memref<1x128xf32, #tpu.memory_space<vmem>>, vector<1x128xf32>
      %cst_9 = arith.constant dense<0.000000e+00> : vector<1xf32>
      %13 = vector.multi_reduction <add>, %12, %cst_9 [1] : vector<1x128xf32> to vector<1xf32>
      %14 = vector.shape_cast %13 : vector<1xf32> to vector<1x1xf32>
      %cst_10 = arith.constant 1.22070313E-4 : f32
      %15 = vector.broadcast %cst_10 : f32 to vector<1x1xf32>
      %16 = arith.mulf %14, %15 : vector<1x1xf32>
      %c0_11 = arith.constant 0 : index
      %17 = memref.load %arg1[%c0_11] : memref<4xf32, #tpu.memory_space<smem>>
      %18 = vector.broadcast %17 : f32 to vector<1x1xf32>
      %c1 = arith.constant 1 : index
      %19 = memref.load %arg1[%c1] : memref<4xf32, #tpu.memory_space<smem>>
      %20 = vector.broadcast %19 : f32 to vector<1x1xf32>
      %c2 = arith.constant 2 : index
      %21 = memref.load %arg1[%c2] : memref<4xf32, #tpu.memory_space<smem>>
      %22 = vector.broadcast %21 : f32 to vector<1x1xf32>
      %c3 = arith.constant 3 : index
      %23 = memref.load %arg1[%c3] : memref<4xf32, #tpu.memory_space<smem>>
      %24 = vector.broadcast %23 : f32 to vector<1x1xf32>
      %25 = math.exp %18 : vector<1x1xf32>
      %cst_12 = arith.constant 9.99999974E-5 : f32
      %cst_13 = arith.constant 5.000000e+00 : f32
      %26 = vector.broadcast %cst_12 : f32 to vector<1x1xf32>
      %27 = arith.maximumf %26, %25 : vector<1x1xf32>
      %28 = vector.broadcast %cst_13 : f32 to vector<1x1xf32>
      %29 = arith.minimumf %28, %27 : vector<1x1xf32>
      %cst_14 = arith.constant 5.000000e-01 : f32
      %30 = vector.broadcast %cst_14 : f32 to vector<1x1xf32>
      %31 = arith.subf %24, %30 : vector<1x1xf32>
      %cst_15 = arith.constant 3.000000e-01 : f32
      %32 = vector.broadcast %cst_15 : f32 to vector<1x1xf32>
      %33 = arith.mulf %31, %32 : vector<1x1xf32>
      %cst_16 = arith.constant 1.000000e+00 : f32
      %34 = vector.broadcast %cst_16 : f32 to vector<1x1xf32>
      %35 = arith.addf %34, %33 : vector<1x1xf32>
      %cst_17 = arith.constant 5.000000e-01 : f32
      %cst_18 = arith.constant 2.000000e+00 : f32
      %36 = vector.broadcast %cst_17 : f32 to vector<1x1xf32>
      %37 = arith.maximumf %36, %35 : vector<1x1xf32>
      %38 = vector.broadcast %cst_18 : f32 to vector<1x1xf32>
      %39 = arith.minimumf %38, %37 : vector<1x1xf32>
      %40 = arith.subf %16, %20 : vector<1x1xf32>
      %cst_19 = arith.constant 1.000000e-07 : f32
      %41 = vector.broadcast %cst_19 : f32 to vector<1x1xf32>
      %42 = arith.addf %22, %41 : vector<1x1xf32>
      %43 = arith.divf %40, %42 : vector<1x1xf32>
      %cst_20 = arith.constant 0.000000e+00 : f32
      %44 = vector.broadcast %cst_20 : f32 to vector<1x1xf32>
      %45 = arith.subf %44, %43 : vector<1x1xf32>
      %46 = math.exp %45 : vector<1x1xf32>
      %cst_21 = arith.constant 1.000000e+00 : f32
      %47 = vector.broadcast %cst_21 : f32 to vector<1x1xf32>
      %48 = arith.addf %47, %46 : vector<1x1xf32>
      %cst_22 = arith.constant 2.000000e+00 : f32
      %49 = vector.broadcast %cst_22 : f32 to vector<1x1xf32>
      %50 = arith.divf %49, %48 : vector<1x1xf32>
      %cst_23 = arith.constant 5.000000e-01 : f32
      %51 = vector.broadcast %cst_23 : f32 to vector<1x1xf32>
      %52 = arith.addf %50, %51 : vector<1x1xf32>
      %c0_24 = arith.constant 0 : index
      %c0_25 = arith.constant 0 : index
      %53 = vector.load %arg3[%c0_24, %c0_25] : memref<1x1xf32, #tpu.memory_space<vmem>>, vector<1x1xf32>
      tpu.vector_store %arg3[%c0_24, %c0_25], %29 {strides = array<i32>} : memref<1x1xf32, #tpu.memory_space<vmem>>, vector<1x1xf32>,
      %54 = arith.mulf %29, %39 : vector<1x1xf32>
      %55 = arith.mulf %54, %52 : vector<1x1xf32>
      %c0_26 = arith.constant 0 : index
      %c0_27 = arith.constant 0 : index
      %56 = vector.load %arg4[%c0_26, %c0_27] : memref<1x1xf32, #tpu.memory_space<vmem>>, vector<1x1xf32>
      tpu.vector_store %arg4[%c0_26, %c0_27], %55 {strides = array<i32>} : memref<1x1xf32, #tpu.memory_space<vmem>>, vector<1x1xf32>,
    } else {
    }
    return
  }
  func.func @transform_0(%arg0: i32) -> i32 {
    %c0_i32 = arith.constant 0 : i32
    %c0_i32_0 = arith.constant 0 : i32
    return %c0_i32 : i32
  }
  func.func @transform_1(%arg0: i32) -> (i32, i32) {
    %c0_i32 = arith.constant 0 : i32
    %c0_i32_0 = arith.constant 0 : i32
    return %arg0, %c0_i32 : i32, i32
  }
  func.func @transform_2(%arg0: i32) -> (i32, i32) {
    %c0_i32 = arith.constant 0 : i32
    %c0_i32_0 = arith.constant 0 : i32
    %c0_i32_1 = arith.constant 0 : i32
    return %c0_i32, %c0_i32_0 : i32, i32
  }
  func.func @transform_3(%arg0: i32) -> (i32, i32) {
    %c0_i32 = arith.constant 0 : i32
    %c0_i32_0 = arith.constant 0 : i32
    %c0_i32_1 = arith.constant 0 : i32
    return %c0_i32, %c0_i32_0 : i32, i32
  }
}

</mosaic_0001>

<bundles_post_ra>
// kernel: tpu_custom_call.1
= control target key start
LH: loop header
LB: loop body
LE: loop exit
PB: predicated region body
PF: predicated region fallthrough
CT: control target
= control target key end

     0   :  { %9 = vsyncpa [#allocation6], 0  ;;  %s788_s0 = inlined_call_operand.hbm [shape: f32[4], index: 0, kind: input, shape index: {}]   ;;  %s789_s1 = inlined_call_operand.hbm [shape: f32[64,128], index: 1, kind: input, shape index: {}]   ;;  %s790_s2 = inlined_call_operand.hbm [shape: f32[1,1], index: 2, kind: output, shape index: {0}]   ;;  %s791_s3 = inlined_call_operand.hbm [shape: f32[1,1], index: 3, kind: output, shape index: {1}]  }
   0x1   :  { %10 = vsyncpa [#allocation4], 0 }
   0x2   :  { %12 = vsyncpa [#allocation4 + $0x1], 0 }
   0x3   :  { %13 = vsyncpa [#allocation5], 0 }
   0x4   :  { %14 = vsyncpa [#allocation10], 0  ;;  %s608_s12 = smov 0   ;;  %s610_s13 = smov 0  }
   0x5   :  { %s612_s14 = smov 0   ;;  %s614_s15 = smov 0  }
   0x6 LB: > { %s627_s16 = sadd.s32 4294967295, %s579_s15   ;;  %s630_s17 = sadd.s32 1, %s579_s15   ;;  %s579_s15 = sphi %s614_s15, %s804_s15   ;;  %s575_s14 = sphi %s612_s14, %s803_s14   ;;  %s571_s13 = sphi %s610_s13, %s802_s13   ;;  %s567_s12 = sphi %s608_s12, %s801_s12  }
   0x7   : > { %s45_s18 = ssub.s32 %s579_s15, %s630_s17  ;;  %s48_s19 = sadd.s32 1, %s575_s14 }
   0x8   : > { %p46_p0 = scmp.eq.s32.totalorder %s45_s18, 0  ;;  %p55_p1 = scmp.ne.s32.totalorder %s575_s14, %s571_s13 }
   0x9   : > { %p56_p2 = scmp.eq.s32.totalorder %s579_s15, 0  ;;  %p61_p3 = scmp.ne.s32.totalorder %s571_s13, %s567_s12 }
   0xa   : > { %s640_s20 = scalar_select %p46_p0, %s575_s14, %s48_s19  }
   0xb   : > { %p57_p4 = por %p56_p2, %p55_p1  ;;  %p792_p5 = scmp.eq.s32.totalorder %s627_s16, 0 }
   0xc   : > { %p341_p6 = scmp.ge.s32.totalorder %s579_s15, 1  ;;  %p114_p7 = scmp.lt.s32.totalorder %s579_s15, 5 }
   0xd   : > { %p647_p8 = por %p792_p5, %p61_p3  ;;  %p386_p11 = scmp.lt.s32.totalorder %s579_s15, 4 }
   0xe   : > { %p652_p10 = pnand %p341_p6, %p114_p7  ;;  %s136_s23 = sand.u32 1, %s575_s14  }
   0xf   : > { %s794_s21 = scalar_select %p647_p8, 1, 0 }
  0x10   : > { %p377_p12 = pneg %p652_p10  ;;  %p660_p13 = pnand %p386_p11, %p57_p4 }
  0x11   : > { %s344_s25 = sshll.u32 %s136_s23, 4  ;;  %s362_s26 = sshll.u32 %s579_s15, 8 }
  0x12   : > { %p378_p0 = pnand %p377_p12, %p792_p5  ;;  %s438_s29 = scalar_lea.hbm %s788_s0, 16 }
  0x13   : > { %p439_p1 = scmp.ne.s32.totalorder %s788_s0, %s438_s29  ;;  %p445_p4 = scmp.lt.u32.totalorder %s438_s29, %s788_s0 }
  0x14   : > { %p440_p2 = pneg %p378_p0 }
  0x16   : > { %p441_p3 = pnand %p440_p2, %p439_p1 }
  0x18   : > { %p442_p6 = pneg %p441_p3 }
  0x1a   : > { %p447_p7 = pnand %p445_p4, %p442_p6 }
  0x1c   : > { %450 = shalt.err (!%p447_p7)
}
  0x1d   : > { %s581_s7 = smov [#allocation3]   ;;  %s682_s12 = scalar_lea.hbm %s789_s1, %s362_s26 }
  0x1e   : > { %380 = dma.hbm_to_smem (!%p378_p0), %s788_s0, 16, %s581_s7, [#allocation6]  }
  0x1f   : > { %s140_s15 = scalar_lea.vmem [#allocation7], %s344_s25  ;;  %s686_s19 = scalar_lea.sflag [#allocation4], %s136_s23 }
  0x20   : > { %s147_s18 = sshll.u32 %s140_s15, 4  ;;  %s451_s27 = scalar_lea.hbm %s682_s12, 256  ;;  %s684_s18 = int_to_ptr.vmem [resolvable:$true] %s147_s18 }
  0x21   : > { %p452_p11 = scmp.ne.s32.totalorder %s682_s12, %s451_s27  ;;  %p453_p12 = pneg %p660_p13 }
  0x22   : > { %s456_s29 = scalar_lea.hbm %s789_s1, 1024  ;;  %p457_p2 = scmp.lt.u32.totalorder %s682_s12, %s789_s1 }
  0x23   : > { %p454_p0 = pnand %p453_p12, %p452_p11  ;;  %p458_p3 = scmp.lt.u32.totalorder %s456_s29, %s451_s27 }
  0x24   : > { %p460_p4 = scmp.lt.u32.totalorder %s451_s27, %s682_s12 }
  0x25   : > { %p455_p1 = pneg %p454_p0  ;;  %p459_p6 = por %p458_p3, %p457_p2 }
  0x27   : > { %p461_p7 = por %p460_p4, %p459_p6 }
  0x29   : > { %p462_p9 = pnand %p461_p7, %p455_p1 }
  0x2b   : > { %465 = shalt.err (!%p462_p9)
}
  0x2c   : > { %s466_s23 = scalar_lea.vmem %s684_s18, 256  ;;  %s582_s25 = smov [#allocation7]  }
  0x2d   : > { %p467_p11 = scmp.ne.s32.totalorder %s684_s18, %s466_s23  ;;  %s471_s5 = sshll.u32 %s582_s25, 4  ;;  %s472_s5 = int_to_ptr.vmem [resolvable:$false] %s471_s5 }
  0x2e   : > { %s473_s6 = scalar_lea.vmem %s472_s5, 512  ;;  %p474_p8 = scmp.lt.s32.totalorder %s684_s18, %s472_s5 }
  0x2f   : > { %p469_p0 = pnand %p467_p11, %p453_p12  ;;  %p475_p2 = scmp.lt.s32.totalorder %s473_s6, %s466_s23 }
  0x31   : > { %p470_p5 = pneg %p469_p0  ;;  %p476_p3 = por %p475_p2, %p474_p8 }
  0x33   : > { %p477_p6 = pnand %p476_p3, %p470_p5 }
  0x35   : > { %480 = shalt.err (!%p477_p6)
}
  0x36   : > { %s583_s7 = smov 128   ;;  %s584_s8 = smov 8  }
  0x37   : > { %384 = dma.hbm_to_vmem [thread:$0]  (!%p660_p13), %s682_s12, 256, %s684_s18, %s686_s19, %s583_s7, %s583_s7, %s584_s8  }
  0x38   : > { %159 = sbr.rel (%p652_p10) target bundleno = 336 (0x150), region = 28  ;;  %p797_p9 = scmp.eq.s32.totalorder (!%p652_p10), %s627_s16, 0 }
  0x3f   : > { %550 = dma.done.wait (%p797_p9), [#allocation6], 16   ;;  %p798_p12 = pmov %p797_p9 }
  0x40   : > { %s165_s9 = sand.u32 1, %s571_s13   ;;  %p799_p5 = scmp.ne.s32.totalorder %s794_s21, 0 }
  0x41   : > { %552 = vsyncadd (%p798_p12), [#allocation6], 4294967280  ;;  %s349_s10 = sshll.u32 %s165_s9, 4  ;;  %s166_s11 = scalar_lea.sflag [#allocation4], %s165_s9 }
  0x42   : > { %s169_s15 = scalar_lea.vmem [#allocation7], %s349_s10 }
  0x43   : > { %554 = dma.done.wait (%p799_p5), %s166_s11, 256  }
  0x44   : > { %556 = vsyncadd (%p799_p5), %s166_s11, 4294967040 }
  0x45   : > { %174 = sfence }
  0x46   : > { %p800_p8 = scmp.ne.s32.totalorder %s627_s16, 0 }
  0x47   : > { %v585_v0 = vmov (!%p800_p8), 0.0  }
  0x48   : > { %192 = sbr.rel (%p800_p8) target bundleno = 79 (0x4f), region = 40  ;;  %193 = vst [vmem:[#allocation2] sm:$0x1] (!%p800_p8), %v585_v0 }
  0x4f PF: > { %v195_v1 = vld [vmem:[%s169_s15] sm:$0xff]  ;;  %v196_v2 = vld [vmem:[%s169_s15 + $0x8] sm:$0xff]  ;;  %p351_p10 = scmp.ne.s32.totalorder %s627_s16, 3 }
  0x50   : > { %v197_v3 = vadd.f32 %v196_v2, %v195_v1  ;;  %v194_v9 = vld [vmem:[#allocation2] sm:$0x1]  ;;  %vm211_vm0 = vcmask (!%p351_p10), 1040384   ;;  %s216_s21 = sld [smem:[#allocation3]] (!%p351_p10)  ;;  %vm244_vm1 = vcmask (!%p351_p10), 0   ;;  %s353_s22 = sld [smem:[#allocation3 + $0x2]] (!%p351_p10) }
  0x51   : > { %s352_s24 = sld [smem:[#allocation3 + $0x1]] (!%p351_p10)  ;;  %s354_s12 = sld [smem:[#allocation3 + $0x3]] (!%p351_p10) }
  0x52   : > { %v198_v4 = vrot.slane %v197_v3, 4 }
  0x54   : > { %v199_v5 = vadd.f32 %v198_v4, %v197_v3 }
  0x56   : > { %v200_v6 = vrot.slane %v199_v5, 2  ;;  %v217_v14 = vstv (!%p351_p10), %s216_s21  ;;  %v221_v19 = vstv (!%p351_p10), %s353_s22 }
  0x57   : > { %v224_v15 = vmul.f32 (!%p351_p10), 1.442695, %v217_v14  ;;  %v234_v20 = vadd.f32 (!%p351_p10), 1e-07, %v221_v19  ;;  %v219_v22 = vstv (!%p351_p10), %s352_s24  ;;  %v223_v29 = vstv (!%p351_p10), %s354_s12 }
  0x58   : > { %v201_v7 = vadd.f32 %v200_v6, %v199_v5  ;;  %v355_v30 = vadd.f32 (!%p351_p10), -0.5, %v223_v29 }
  0x59   : > { %430 = vpow2.f32 (!%p351_p10), %v224_v15 }
  0x5a   : > { %v202_v8 = vrot.slane %v201_v7, 1  ;;  %209 = sbr.rel (%p351_p10) target bundleno = 288 (0x120), region = 44  ;;  %432 = vrcp.f32 (!%p351_p10), %v234_v20  ;;  %v229_v31 = vmul.f32 (!%p351_p10), 0.3, %v355_v30 }
  0x5c   : > { %v203_v10 = vadd.f32 %v202_v8, %v201_v7  ;;  %v230_v34 = vadd.f32 (!%p351_p10), 1.0, %v229_v31 }
  0x5e   : > { %v204_v11 = vadd.f32 %v203_v10, %v194_v9  ;;  %v231_v35 = vmax.f32 (!%p351_p10), %v230_v34, 0.5 }
  0x60   : > { %205 = vst [vmem:[#allocation2] sm:$0x1] %v204_v11  ;;  %v232_v36 = vmin.f32 (!%p351_p10), %v231_v35, 2.0 }
  0x63   : > { %v431_v16 = vpop.eup %430 }
  0x64   : > { %v226_v17 = vmax.f32 %v431_v16, 0.0001  ;;  %v433_v24 = vpop.eup %432 }
  0x66   : > { %v227_v18 = vmin.f32 %v226_v17, 5.0 }
  0x67   : > { %v210_v12 = vld [vmem:[#allocation2] sm:$0x1] }
  0x68   : > { %v212_v13 = vsel %vm211_vm0, %v210_v12, 0.0  ;;  %245 = vst.msk [vmem:[#allocation8] sm:$0x1] %vm244_vm1, %v227_v18  ;;  %v246_v39 = vmul.f32 %v232_v36, %v227_v18 }
  0x69   : > { %213 = vadd.xlane.f32.xlu0 %v212_v13 }
  0xf6   : > { %v214_v21 = vpop.xlane.xlu0 %213 }
  0xf7   : > { %v215_v23 = vmul.f32 0.00012207031, %v214_v21 }
  0xf9   : > { %v233_v25 = vsub.f32 %v215_v23, %v219_v22 }
  0xfb   : > { %v236_v26 = vmul.f32 %v433_v24, %v233_v25 }
  0xfd   : > { %v237_v27 = vsub.f32 0.0, %v236_v26 }
  0xff   : > { %v238_v28 = vmul.f32 1.442695, %v237_v27 }
 0x101   : > { %434 = vpow2.f32 %v238_v28 }
 0x10b   : > { %v435_v32 = vpop.eup %434 }
 0x10c   : > { %v240_v33 = vadd.f32 1.0, %v435_v32 }
 0x10e   : > { %436 = vrcp.f32 %v240_v33 }
 0x118   : > { %v437_v37 = vpop.eup %436 }
 0x119   : > { %v242_v38 = vmul.f32 2.0, %v437_v37 }
 0x11b   : > { %v243_v40 = vadd.f32 0.5, %v242_v38 }
 0x11d   : > { %v247_v41 = vmul.f32 %v246_v39, %v243_v40 }
 0x11f   : > { %248 = vst.msk [vmem:[#allocation9] sm:$0x1] %vm244_vm1, %v247_v41 }
 0x120 PF: > { %p388_p13 = scmp.eq.s32.totalorder %s627_s16, 3  ;;  %s586_s18 = smov [#allocation8]  }
 0x121   : > { %s256_s19 = sshll.u32 %s586_s18, 4  ;;  %s587_s27 = smov [#allocation9]   ;;  %s257_s19 = int_to_ptr.vmem [resolvable:$true] %s256_s19 }
 0x122   : > { %s267_s26 = sshll.u32 %s587_s27, 4  ;;  %s481_s28 = scalar_lea.vmem %s257_s19, 16  ;;  %s268_s26 = int_to_ptr.vmem [resolvable:$true] %s267_s26 }
 0x123   : > { %p482_p1 = scmp.ne.s32.totalorder %s257_s19, %s481_s28  ;;  %s487_s29 = scalar_lea.vmem %s257_s19, 32 }
 0x124   : > { %p488_p11 = scmp.lt.s32.totalorder %s257_s19, %s257_s19  ;;  %p489_p0 = scmp.lt.s32.totalorder %s487_s29, %s481_s28 }
 0x125   : > { %p483_p4 = pnand %p482_p1, %p388_p13 }
 0x126   : > { %p490_p2 = por %p489_p0, %p488_p11 }
 0x127   : > { %p484_p7 = pneg %p483_p4 }
 0x129   : > { %p491_p3 = pnand %p490_p2, %p484_p7 }
 0x12b   : > { %494 = shalt.err (!%p491_p3)
}
 0x12c   : > { %s495_s23 = scalar_lea.hbm %s790_s2, 16 }
 0x12d   : > { %p496_p6 = scmp.ne.s32.totalorder %s790_s2, %s495_s23  ;;  %p501_p5 = scmp.lt.u32.totalorder %s495_s23, %s790_s2 }
 0x12f   : > { %p497_p9 = pnand %p496_p6, %p388_p13 }
 0x131   : > { %p498_p12 = pneg %p497_p9 }
 0x133   : > { %p503_p8 = pnand %p501_p5, %p498_p12 }
 0x135   : > { %506 = shalt.err (!%p503_p8)
}
 0x136   : > { %370 = dma.vmem_to_hbm [thread:$0]  (%p388_p13), %s257_s19, 16, %s790_s2, [#allocation5]  }
 0x137   : > { %s507_s10 = scalar_lea.vmem %s268_s26, 16  ;;  %s513_s11 = scalar_lea.vmem %s268_s26, 32 }
 0x138   : > { %p508_p10 = scmp.ne.s32.totalorder %s268_s26, %s507_s10  ;;  %p514_p7 = scmp.lt.s32.totalorder %s268_s26, %s268_s26 }
 0x139   : > { %p515_p11 = scmp.lt.s32.totalorder %s513_s11, %s507_s10 }
 0x13a   : > { %p509_p1 = pnand %p508_p10, %p388_p13 }
 0x13b   : > { %p516_p0 = por %p515_p11, %p514_p7 }
 0x13c   : > { %p510_p4 = pneg %p509_p1 }
 0x13e   : > { %p517_p2 = pnand %p516_p0, %p510_p4 }
 0x140   : > { %520 = shalt.err (!%p517_p2)
}
 0x141   : > { %s521_s22 = scalar_lea.hbm %s791_s3, 16 }
 0x142   : > { %p522_p3 = scmp.ne.s32.totalorder %s791_s3, %s521_s22  ;;  %p527_p12 = scmp.lt.u32.totalorder %s521_s22, %s791_s3 }
 0x144   : > { %p523_p6 = pnand %p522_p3, %p388_p13 }
 0x146   : > { %p524_p9 = pneg %p523_p6 }
 0x148   : > { %p529_p5 = pnand %p527_p12, %p524_p9 }
 0x14a   : > { %532 = shalt.err (!%p529_p5)
}
 0x14b   : > { %372 = dma.vmem_to_hbm [thread:$0]  (%p388_p13), %s268_s26, 16, %s791_s3, [#allocation10]  }
 0x14c   : > { %558 = dma.done.wait (%p388_p13), [#allocation5], 16  }
 0x14d   : > { %560 = vsyncadd (%p388_p13), [#allocation5], 4294967280 }
 0x14e   : > { %562 = dma.done.wait (%p388_p13), [#allocation10], 16  }
 0x14f   : > { %564 = vsyncadd (%p388_p13), [#allocation10], 4294967280 }
 0x150 PF: > { %p17_p8 = scmp.ge.s32.totalorder %s630_s17, 6   ;;  %s801_s12 = smov %s571_s13 }
 0x151   : > { %s802_s13 = smov %s575_s14  ;;  %s803_s14 = smov %s640_s20 }
 0x152   : > { %s804_s15 = smov %s630_s17  ;;  %19 = sbr.rel (!%p17_p8) target bundleno = 6 (0x6), region = 86 }
 0x159   :  { %284 = vsyncpa [#allocation4], 1 }
 0x15a   :  { %286 = vsyncpa [#allocation4 + $0x1], 1 }
 0x15b   :  { %287 = vsyncpa [#allocation5], 1 }
 0x15c   :  { %289 = vsyncpa [#allocation5 + $0x1], 1 }
 0x15d   :  { %290 = vsyncpa [#allocation10], 1 }
 0x15e   :  { %291 = vsyncpa [#allocation6], 1 }
 0x15f   :  { %293 = vsyncpa [#allocation6 + $0x1], 1 }

</bundles_post_ra>
